<compile_context>
chip_gen: v5e
topology: v5e:2x2
jax: 0.10.0
libtpu: 0.0.40
codegen_flags: <defaults>
</compile_context>

<pallas_src>
import jax
import jax.numpy as jnp
import numpy as np
from jax.experimental import pallas as pl
from jax.experimental.pallas import tpu as pltpu

BN_EPS = 1e-5


def _fr_matmul_stats_kernel(xa_ref, xb_ref, w1_ref, w2_ref, y_ref, stats_ref):
    """relu -> two channel matmuls; write raw y tile + per-tile channel stats."""
    # ReLU (elementwise, VPU).
    xa = jnp.maximum(xa_ref[...], 0.0)
    xb = jnp.maximum(xb_ref[...], 0.0)

    # 1x1 stride-2 convs (subsample already applied) == channel matmuls (MXU).
    # Shapes: (C_half, C_in) @ (C_in, TM) -> (C_half, TM); fp32 accumulation.
    y1 = jnp.dot(w1_ref[...], xa, preferred_element_type=jnp.float32)
    y2 = jnp.dot(w2_ref[...], xb, preferred_element_type=jnp.float32)

    c_half = y1.shape[0]
    # Raw (un-normalized) outputs; first half channels from conv_1, second from
    # conv_2. Disjoint sublane-range stores -- no concat / relayout.
    y_ref[:c_half, :] = y1.astype(y_ref.dtype)
    y_ref[c_half:, :] = y2.astype(y_ref.dtype)

    # Per-tile per-channel partials (lane reductions, XLU): columns are
    # [sum(y1), sum(y2), sum(y1^2), sum(y2^2)].
    stats_ref[:, 0:1] = jnp.sum(y1, axis=1, keepdims=True)
    stats_ref[:, 1:2] = jnp.sum(y2, axis=1, keepdims=True)
    stats_ref[:, 2:3] = jnp.sum(y1 * y1, axis=1, keepdims=True)
    stats_ref[:, 3:4] = jnp.sum(y2 * y2, axis=1, keepdims=True)


def _fr_normalize_kernel(y_ref, scale_ref, shift_ref, o_ref):
    """(y - mean) * inv_std  ==  y * scale + shift  (per-channel, precomputed)."""
    o_ref[...] = y_ref[...] * scale_ref[...] + shift_ref[...]


def factorized_reduce(x_nchw, w1, w2, *, tile_m=512, matmul_dtype=jnp.float32):
    """FactorizedReduce forward.

    x_nchw: (N, C_in, H, W) float32
    w1, w2: (C_out//2, C_in, 1, 1) conv weights (bias=False)
    matmul_dtype: set to jnp.bfloat16 on v6e/v7x for MXU-native matmuls
                  (BN statistics / normalization remain fp32).
    """
    N, C_in, H, W = x_nchw.shape
    assert H % 2 == 0 and W % 2 == 0, "even spatial dims (standard usage)"
    C_half = w1.shape[0]
    C_out = 2 * C_half
    Ho, Wo = H // 2, W // 2
    Mo = Ho * Wo

    x = x_nchw.astype(jnp.float32)
    # Stride-2 spatial subsample (== what the stride-2 1x1 conv sees), kept in
    # NCHW so the reshape to (N, C_in, Ho*Wo) is free and M lands on lanes.
    # TODO(synk): fold the stride-2 subsample into the BlockSpec index_maps
    # (6-D reshape + squeezed stride dims) to avoid this XLA-side pass over x.
    xa = x[:, :, 0::2, 0::2].reshape(N, C_in, Mo)          # feeds conv_1
    xb = x[:, :, 1::2, 1::2].reshape(N, C_in, Mo)          # feeds conv_2 (== x[:,:,1:,1:] subsampled)

    # Tile the flattened spatial axis. Zero padding is harmless for the BN
    # statistics (relu(0)=0 -> w@0 = 0) and the true count is used below.
    if Mo >= tile_m:
        tm = tile_m                                        # multiple of 128
        Mp = pl.cdiv(Mo, tm) * tm
    else:
        tm = Mo                                            # single full-dim tile
        Mp = Mo
    if Mp != Mo:
        pad = Mp - Mo
        xa = jnp.pad(xa, ((0, 0), (0, 0), (0, pad)))
        xb = jnp.pad(xb, ((0, 0), (0, 0), (0, pad)))
    n_m = Mp // tm

    xa = xa.astype(matmul_dtype)
    xb = xb.astype(matmul_dtype)
    w1m = w1.reshape(C_half, C_in).astype(matmul_dtype)
    w2m = w2.reshape(C_half, C_in).astype(matmul_dtype)

    # ---- Pass 1: relu -> matmuls -> raw y tiles + per-tile channel partials.
    y_raw, stats = pl.pallas_call(
        _fr_matmul_stats_kernel,
        grid=(N, n_m),
        out_shape=(
            jax.ShapeDtypeStruct((N, C_out, Mp), jnp.float32),
            jax.ShapeDtypeStruct((N, n_m, C_half, 4), jnp.float32),
        ),
        in_specs=[
            pl.BlockSpec((None, C_in, tm), lambda n, m: (n, 0, m)),
            pl.BlockSpec((None, C_in, tm), lambda n, m: (n, 0, m)),
            pl.BlockSpec((C_half, C_in), lambda n, m: (0, 0)),   # resident weights
            pl.BlockSpec((C_half, C_in), lambda n, m: (0, 0)),
        ],
        out_specs=(
            pl.BlockSpec((None, C_out, tm), lambda n, m: (n, 0, m)),
            pl.BlockSpec((None, None, C_half, 4), lambda n, m: (n, m, 0, 0)),
        ),
        compiler_params=pltpu.CompilerParams(
            dimension_semantics=("parallel", "parallel")),
    )(xa, xb, w1m, w2m)

    # ---- Tiny host-side finalize of the BN statistics (biased batch variance).
    count = jnp.float32(N * Mo)                            # true count (excl. padding)
    sums = jnp.sum(stats, axis=(0, 1))                     # (C_half, 4)
    mean = jnp.concatenate([sums[:, 0], sums[:, 1]]) / count          # (C_out,)
    ex2 = jnp.concatenate([sums[:, 2], sums[:, 3]]) / count
    var = jnp.maximum(ex2 - mean * mean, 0.0)
    inv = jax.lax.rsqrt(var + BN_EPS)
    scale = inv.reshape(C_out, 1)
    shift = (-mean * inv).reshape(C_out, 1)

    # ---- Pass 2: normalize the raw y tiles in place.
    out_flat = pl.pallas_call(
        _fr_normalize_kernel,
        grid=(N, n_m),
        out_shape=jax.ShapeDtypeStruct((N, C_out, Mp), jnp.float32),
        in_specs=[
            pl.BlockSpec((None, C_out, tm), lambda n, m: (n, 0, m)),
            pl.BlockSpec((C_out, 1), lambda n, m: (0, 0)),   # resident scale
            pl.BlockSpec((C_out, 1), lambda n, m: (0, 0)),   # resident shift
        ],
        out_specs=pl.BlockSpec((None, C_out, tm), lambda n, m: (n, 0, m)),
        input_output_aliases={0: 0},                         # normalize in place
        compiler_params=pltpu.CompilerParams(
            dimension_semantics=("parallel", "parallel")),
    )(y_raw, scale, shift)

    # Output is already NCHW: drop M padding and unflatten the spatial axis.
    return out_flat[:, :, :Mo].reshape(N, C_out, Ho, Wo)


def _reference(x_nchw, w1, w2):
    """Pure-JAX reference mirroring the PyTorch forward."""
    x = jnp.maximum(x_nchw, 0.0)
    C_half, C_in = w1.shape[0], w1.shape[1]
    w1m = w1.reshape(C_half, C_in)
    w2m = w2.reshape(C_half, C_in)
    xa = x[:, :, 0::2, 0::2]
    xb = x[:, :, 1:, 1:][:, :, 0::2, 0::2]
    o1 = jnp.einsum("oc,nchw->nohw", w1m, xa)
    o2 = jnp.einsum("oc,nchw->nohw", w2m, xb)
    y = jnp.concatenate([o1, o2], axis=1)
    mean = jnp.mean(y, axis=(0, 2, 3), keepdims=True)
    var = jnp.mean((y - mean) ** 2, axis=(0, 2, 3), keepdims=True)
    return (y - mean) / jnp.sqrt(var + BN_EPS)


if __name__ == "__main__":
    key = jax.random.PRNGKey(0)
    k_x, k_w1, k_w2 = jax.random.split(key, 3)

    N, C_in, H, W = 2, 4, 16, 16
    C_out = 8  # must be even
    C_half = C_out // 2

    x = jax.random.normal(k_x, (N, C_in, H, W), dtype=jnp.float32)
    # Conv2d(C_in, C_out//2, 1, stride=2, bias=False) weights, deterministic.
    fan_in = C_in  # 1x1 kernel
    w1 = jax.random.normal(k_w1, (C_half, C_in, 1, 1), dtype=jnp.float32) / np.sqrt(fan_in)
    w2 = jax.random.normal(k_w2, (C_half, C_in, 1, 1), dtype=jnp.float32) / np.sqrt(fan_in)

    fr = jax.jit(factorized_reduce)
    out = jax.block_until_ready(fr(x, w1, w2))
    ref = jax.block_until_ready(_reference(x, w1, w2))

    assert out.shape == (N, C_out, H // 2, W // 2), out.shape
    np.testing.assert_allclose(np.asarray(out), np.asarray(ref), rtol=1e-4, atol=1e-4)
    print("KERNEL_OK")
</pallas_src>

<mosaic_0001>
module attributes {stable_mosaic.version = 11 : i64} {
  func.func @_fr_matmul_stats_kernel(%arg0: i32, %arg1: i32, %arg2: memref<1x4x64xf32, #tpu.memory_space<vmem>>, %arg3: memref<1x4x64xf32, #tpu.memory_space<vmem>>, %arg4: memref<4x4xf32, #tpu.memory_space<vmem>>, %arg5: memref<4x4xf32, #tpu.memory_space<vmem>>, %arg6: memref<1x8x64xf32, #tpu.memory_space<vmem>>, %arg7: memref<1x1x4x4xf32, #tpu.memory_space<vmem>>) attributes {dimension_semantics = [#tpu.dimension_semantics<parallel>, #tpu.dimension_semantics<parallel>], iteration_bounds = array<i64: 2, 1>, scalar_prefetch = 0 : i64, scratch_operands = 0 : i64, tpu.core_type = #tpu.core_type<tc>, window_params = [{transform_indices = @transform_0, window_bounds = array<i64: 1, 4, 64>}, {transform_indices = @transform_1, window_bounds = array<i64: 1, 4, 64>}, {pipeline_mode = #tpu.pipeline_mode<synchronous>, transform_indices = @transform_2, window_bounds = array<i64: 4, 4>}, {pipeline_mode = #tpu.pipeline_mode<synchronous>, transform_indices = @transform_3, window_bounds = array<i64: 4, 4>}, {transform_indices = @transform_4, window_bounds = array<i64: 1, 8, 64>}, {transform_indices = @transform_5, window_bounds = array<i64: 1, 1, 4, 4>}]} {
    %c0 = arith.constant 0 : index
    %c0_0 = arith.constant 0 : index
    %c0_1 = arith.constant 0 : index
    %0 = vector.load %arg2[%c0, %c0_0, %c0_1] : memref<1x4x64xf32, #tpu.memory_space<vmem>>, vector<1x4x64xf32>
    %1 = vector.shape_cast %0 : vector<1x4x64xf32> to vector<4x64xf32>
    %cst = arith.constant 0.000000e+00 : f32
    %2 = vector.broadcast %cst : f32 to vector<4x64xf32>
    %3 = arith.maximumf %1, %2 : vector<4x64xf32>
    %c0_2 = arith.constant 0 : index
    %c0_3 = arith.constant 0 : index
    %c0_4 = arith.constant 0 : index
    %4 = vector.load %arg3[%c0_2, %c0_3, %c0_4] : memref<1x4x64xf32, #tpu.memory_space<vmem>>, vector<1x4x64xf32>
    %5 = vector.shape_cast %4 : vector<1x4x64xf32> to vector<4x64xf32>
    %cst_5 = arith.constant 0.000000e+00 : f32
    %6 = vector.broadcast %cst_5 : f32 to vector<4x64xf32>
    %7 = arith.maximumf %5, %6 : vector<4x64xf32>
    %c0_6 = arith.constant 0 : index
    %c0_7 = arith.constant 0 : index
    %8 = vector.load %arg4[%c0_6, %c0_7] : memref<4x4xf32, #tpu.memory_space<vmem>>, vector<4x4xf32>
    %cst_8 = arith.constant dense<0.000000e+00> : vector<4x64xf32>
    %9 = tpu.matmul %8, %3, %cst_8 {dimension_numbers = #tpu.dot_dimension_numbers<[1], [0], [0], [1], [0, 0, 1, 1], [], []>} : vector<4x4xf32>, vector<4x64xf32>, vector<4x64xf32> -> vector<4x64xf32>
    %c0_9 = arith.constant 0 : index
    %c0_10 = arith.constant 0 : index
    %10 = vector.load %arg5[%c0_9, %c0_10] : memref<4x4xf32, #tpu.memory_space<vmem>>, vector<4x4xf32>
    %cst_11 = arith.constant dense<0.000000e+00> : vector<4x64xf32>
    %11 = tpu.matmul %10, %7, %cst_11 {dimension_numbers = #tpu.dot_dimension_numbers<[1], [0], [0], [1], [0, 0, 1, 1], [], []>} : vector<4x4xf32>, vector<4x64xf32>, vector<4x64xf32> -> vector<4x64xf32>
    %c0_12 = arith.constant 0 : index
    %c0_13 = arith.constant 0 : index
    %c0_14 = arith.constant 0 : index
    %12 = vector.load %arg6[%c0_12, %c0_13, %c0_14] : memref<1x8x64xf32, #tpu.memory_space<vmem>>, vector<1x4x64xf32>
    %13 = vector.shape_cast %12 : vector<1x4x64xf32> to vector<4x64xf32>
    %14 = vector.shape_cast %9 : vector<4x64xf32> to vector<1x4x64xf32>
    tpu.vector_store %arg6[%c0_12, %c0_13, %c0_14], %14 {strides = array<i32>} : memref<1x8x64xf32, #tpu.memory_space<vmem>>, vector<1x4x64xf32>,
    %c0_15 = arith.constant 0 : index
    %c4 = arith.constant 4 : index
    %c0_16 = arith.constant 0 : index
    %15 = vector.load %arg6[%c0_15, %c4, %c0_16] : memref<1x8x64xf32, #tpu.memory_space<vmem>>, vector<1x4x64xf32>
    %16 = vector.shape_cast %15 : vector<1x4x64xf32> to vector<4x64xf32>
    %17 = vector.shape_cast %11 : vector<4x64xf32> to vector<1x4x64xf32>
    tpu.vector_store %arg6[%c0_15, %c4, %c0_16], %17 {strides = array<i32>} : memref<1x8x64xf32, #tpu.memory_space<vmem>>, vector<1x4x64xf32>,
    %cst_17 = arith.constant dense<0.000000e+00> : vector<4xf32>
    %18 = vector.multi_reduction <add>, %9, %cst_17 [1] : vector<4x64xf32> to vector<4xf32>
    %19 = vector.shape_cast %18 : vector<4xf32> to vector<4x1xf32>
    %c0_18 = arith.constant 0 : index
    %c0_19 = arith.constant 0 : index
    %c0_20 = arith.constant 0 : index
    %c0_21 = arith.constant 0 : index
    %20 = vector.load %arg7[%c0_18, %c0_19, %c0_20, %c0_21] : memref<1x1x4x4xf32, #tpu.memory_space<vmem>>, vector<1x1x4x1xf32>
    %21 = vector.shape_cast %20 : vector<1x1x4x1xf32> to vector<4x1xf32>
    %22 = vector.shape_cast %19 : vector<4x1xf32> to vector<1x1x4x1xf32>
    tpu.vector_store %arg7[%c0_18, %c0_19, %c0_20, %c0_21], %22 {strides = array<i32>} : memref<1x1x4x4xf32, #tpu.memory_space<vmem>>, vector<1x1x4x1xf32>,
    %cst_22 = arith.constant dense<0.000000e+00> : vector<4xf32>
    %23 = vector.multi_reduction <add>, %11, %cst_22 [1] : vector<4x64xf32> to vector<4xf32>
    %24 = vector.shape_cast %23 : vector<4xf32> to vector<4x1xf32>
    %c0_23 = arith.constant 0 : index
    %c0_24 = arith.constant 0 : index
    %c0_25 = arith.constant 0 : index
    %c1 = arith.constant 1 : index
    %25 = vector.load %arg7[%c0_23, %c0_24, %c0_25, %c1] : memref<1x1x4x4xf32, #tpu.memory_space<vmem>>, vector<1x1x4x1xf32>
    %26 = vector.shape_cast %25 : vector<1x1x4x1xf32> to vector<4x1xf32>
    %27 = vector.shape_cast %24 : vector<4x1xf32> to vector<1x1x4x1xf32>
    tpu.vector_store %arg7[%c0_23, %c0_24, %c0_25, %c1], %27 {strides = array<i32>} : memref<1x1x4x4xf32, #tpu.memory_space<vmem>>, vector<1x1x4x1xf32>,
    %28 = arith.mulf %9, %9 : vector<4x64xf32>
    %cst_26 = arith.constant dense<0.000000e+00> : vector<4xf32>
    %29 = vector.multi_reduction <add>, %28, %cst_26 [1] : vector<4x64xf32> to vector<4xf32>
    %30 = vector.shape_cast %29 : vector<4xf32> to vector<4x1xf32>
    %c0_27 = arith.constant 0 : index
    %c0_28 = arith.constant 0 : index
    %c0_29 = arith.constant 0 : index
    %c2 = arith.constant 2 : index
    %31 = vector.load %arg7[%c0_27, %c0_28, %c0_29, %c2] : memref<1x1x4x4xf32, #tpu.memory_space<vmem>>, vector<1x1x4x1xf32>
    %32 = vector.shape_cast %31 : vector<1x1x4x1xf32> to vector<4x1xf32>
    %33 = vector.shape_cast %30 : vector<4x1xf32> to vector<1x1x4x1xf32>
    tpu.vector_store %arg7[%c0_27, %c0_28, %c0_29, %c2], %33 {strides = array<i32>} : memref<1x1x4x4xf32, #tpu.memory_space<vmem>>, vector<1x1x4x1xf32>,
    %34 = arith.mulf %11, %11 : vector<4x64xf32>
    %cst_30 = arith.constant dense<0.000000e+00> : vector<4xf32>
    %35 = vector.multi_reduction <add>, %34, %cst_30 [1] : vector<4x64xf32> to vector<4xf32>
    %36 = vector.shape_cast %35 : vector<4xf32> to vector<4x1xf32>
    %c0_31 = arith.constant 0 : index
    %c0_32 = arith.constant 0 : index
    %c0_33 = arith.constant 0 : index
    %c3 = arith.constant 3 : index
    %37 = vector.load %arg7[%c0_31, %c0_32, %c0_33, %c3] : memref<1x1x4x4xf32, #tpu.memory_space<vmem>>, vector<1x1x4x1xf32>
    %38 = vector.shape_cast %37 : vector<1x1x4x1xf32> to vector<4x1xf32>
    %39 = vector.shape_cast %36 : vector<4x1xf32> to vector<1x1x4x1xf32>
    tpu.vector_store %arg7[%c0_31, %c0_32, %c0_33, %c3], %39 {strides = array<i32>} : memref<1x1x4x4xf32, #tpu.memory_space<vmem>>, vector<1x1x4x1xf32>,
    return
  }
  func.func @transform_0(%arg0: i32, %arg1: i32) -> (i32, i32, i32) {
    %c0_i32 = arith.constant 0 : i32
    %c0_i32_0 = arith.constant 0 : i32
    return %arg0, %c0_i32, %arg1 : i32, i32, i32
  }
  func.func @transform_1(%arg0: i32, %arg1: i32) -> (i32, i32, i32) {
    %c0_i32 = arith.constant 0 : i32
    %c0_i32_0 = arith.constant 0 : i32
    return %arg0, %c0_i32, %arg1 : i32, i32, i32
  }
  func.func @transform_2(%arg0: i32, %arg1: i32) -> (i32, i32) {
    %c0_i32 = arith.constant 0 : i32
    %c0_i32_0 = arith.constant 0 : i32
    %c0_i32_1 = arith.constant 0 : i32
    return %c0_i32, %c0_i32_0 : i32, i32
  }
  func.func @transform_3(%arg0: i32, %arg1: i32) -> (i32, i32) {
    %c0_i32 = arith.constant 0 : i32
    %c0_i32_0 = arith.constant 0 : i32
    %c0_i32_1 = arith.constant 0 : i32
    return %c0_i32, %c0_i32_0 : i32, i32
  }
  func.func @transform_4(%arg0: i32, %arg1: i32) -> (i32, i32, i32) {
    %c0_i32 = arith.constant 0 : i32
    %c0_i32_0 = arith.constant 0 : i32
    return %arg0, %c0_i32, %arg1 : i32, i32, i32
  }
  func.func @transform_5(%arg0: i32, %arg1: i32) -> (i32, i32, i32, i32) {
    %c0_i32 = arith.constant 0 : i32
    %c0_i32_0 = arith.constant 0 : i32
    %c0_i32_1 = arith.constant 0 : i32
    return %arg0, %arg1, %c0_i32, %c0_i32_0 : i32, i32, i32, i32
  }
}

module attributes {stable_mosaic.version = 11 : i64} {
  func.func @_fr_normalize_kernel(%arg0: i32, %arg1: i32, %arg2: memref<1x8x64xf32, #tpu.memory_space<vmem>>, %arg3: memref<8x1xf32, #tpu.memory_space<vmem>>, %arg4: memref<8x1xf32, #tpu.memory_space<vmem>>, %arg5: memref<1x8x64xf32, #tpu.memory_space<vmem>>) attributes {dimension_semantics = [#tpu.dimension_semantics<parallel>, #tpu.dimension_semantics<parallel>], iteration_bounds = array<i64: 2, 1>, scalar_prefetch = 0 : i64, scratch_operands = 0 : i64, tpu.core_type = #tpu.core_type<tc>, window_params = [{transform_indices = @transform_0, window_bounds = array<i64: 1, 8, 64>}, {pipeline_mode = #tpu.pipeline_mode<synchronous>, transform_indices = @transform_1, window_bounds = array<i64: 8, 1>}, {pipeline_mode = #tpu.pipeline_mode<synchronous>, transform_indices = @transform_2, window_bounds = array<i64: 8, 1>}, {transform_indices = @transform_3, window_bounds = array<i64: 1, 8, 64>}]} {
    %c0 = arith.constant 0 : index
    %c0_0 = arith.constant 0 : index
    %c0_1 = arith.constant 0 : index
    %0 = vector.load %arg2[%c0, %c0_0, %c0_1] : memref<1x8x64xf32, #tpu.memory_space<vmem>>, vector<1x8x64xf32>
    %1 = vector.shape_cast %0 : vector<1x8x64xf32> to vector<8x64xf32>
    %c0_2 = arith.constant 0 : index
    %c0_3 = arith.constant 0 : index
    %2 = vector.load %arg3[%c0_2, %c0_3] : memref<8x1xf32, #tpu.memory_space<vmem>>, vector<8x1xf32>
    %3 = vector.broadcast %2 : vector<8x1xf32> to vector<8x64xf32>
    %4 = arith.mulf %1, %3 : vector<8x64xf32>
    %c0_4 = arith.constant 0 : index
    %c0_5 = arith.constant 0 : index
    %5 = vector.load %arg4[%c0_4, %c0_5] : memref<8x1xf32, #tpu.memory_space<vmem>>, vector<8x1xf32>
    %6 = vector.broadcast %5 : vector<8x1xf32> to vector<8x64xf32>
    %7 = arith.addf %4, %6 : vector<8x64xf32>
    %c0_6 = arith.constant 0 : index
    %c0_7 = arith.constant 0 : index
    %c0_8 = arith.constant 0 : index
    %8 = vector.load %arg5[%c0_6, %c0_7, %c0_8] : memref<1x8x64xf32, #tpu.memory_space<vmem>>, vector<1x8x64xf32>
    %9 = vector.shape_cast %8 : vector<1x8x64xf32> to vector<8x64xf32>
    %10 = vector.shape_cast %7 : vector<8x64xf32> to vector<1x8x64xf32>
    tpu.vector_store %arg5[%c0_6, %c0_7, %c0_8], %10 {strides = array<i32>} : memref<1x8x64xf32, #tpu.memory_space<vmem>>, vector<1x8x64xf32>,
    return
  }
  func.func @transform_0(%arg0: i32, %arg1: i32) -> (i32, i32, i32) {
    %c0_i32 = arith.constant 0 : i32
    %c0_i32_0 = arith.constant 0 : i32
    return %arg0, %c0_i32, %arg1 : i32, i32, i32
  }
  func.func @transform_1(%arg0: i32, %arg1: i32) -> (i32, i32) {
    %c0_i32 = arith.constant 0 : i32
    %c0_i32_0 = arith.constant 0 : i32
    %c0_i32_1 = arith.constant 0 : i32
    return %c0_i32, %c0_i32_0 : i32, i32
  }
  func.func @transform_2(%arg0: i32, %arg1: i32) -> (i32, i32) {
    %c0_i32 = arith.constant 0 : i32
    %c0_i32_0 = arith.constant 0 : i32
    %c0_i32_1 = arith.constant 0 : i32
    return %c0_i32, %c0_i32_0 : i32, i32
  }
  func.func @transform_3(%arg0: i32, %arg1: i32) -> (i32, i32, i32) {
    %c0_i32 = arith.constant 0 : i32
    %c0_i32_0 = arith.constant 0 : i32
    return %arg0, %c0_i32, %arg1 : i32, i32, i32
  }
}

</mosaic_0001>

<bundles_post_ra>
// kernel: factorized_reduce.2
= control target key start
LH: loop header
LB: loop body
LE: loop exit
PB: predicated region body
PF: predicated region fallthrough
CT: control target
= control target key end

     0   :  { %s606_s18 = smov 0   ;;  %s608_s19 = smov 0   ;;  %s656_s0 = inlined_call_operand.vmem [shape: f32[2,4,64], index: 0, kind: input, shape index: {}]   ;;  %s657_s1 = inlined_call_operand.vmem [shape: f32[2,4,64], index: 1, kind: input, shape index: {}]   ;;  %s658_s2 = inlined_call_operand.vmem [shape: f32[4,4], index: 2, kind: input, shape index: {}]   ;;  %s659_s3 = inlined_call_operand.vmem [shape: f32[4,4], index: 3, kind: input, shape index: {}]   ;;  %s660_s4 = inlined_call_operand.vmem [shape: f32[2,8,64], index: 4, kind: output, shape index: {0}]   ;;  %s661_s5 = inlined_call_operand.vmem [shape: f32[2,1,4,4], index: 5, kind: output, shape index: {1}]  }
   0x1   :  { %s610_s20 = smov 0  }
   0x2 LB: > { %s28_s21 = sadd.s32 1, %s570_s19  ;;  %p517_p0 = scmp.ge.s32.totalorder %s574_s20, 1  ;;  %s574_s20 = sphi %s610_s20, %s16_s20   ;;  %s570_s19 = sphi %s608_s19, %s663_s19   ;;  %s566_s18 = sphi %s606_s18, %s662_s18  }
   0x3   : > { %p30_p1 = scmp.ge.s32.totalorder %s28_s21, 2  ;;  %p224_p2 = scmp.lt.s32.totalorder %s574_s20, 3 }
   0x5   : > { %s665_s21 = smov (%p30_p1, %s28_s21), 0  ;;  %p225_p3 = pnand %p517_p0, %p224_p2 }
   0x6   : > { %p270_p4 = scmp.lt.s32.totalorder (!%p225_p3), %s566_s18, 1 }
   0x7   : > { %228 = sbr.rel (%p225_p3) target bundleno = 273 (0x111), region = 36 }
   0xc   : > { %s667_s18 = smov (!%p270_p4, %s566_s18), 1  ;;  %vm307_vm0 = vcmask 1043456   ;;  %v302_v1 = vld [vmem:[%s658_s2] sm:$0xf]  ;;  %vm303_vm1 = vcmask 31744   ;;  %vm358_vm2 = vcmask 519168  }
   0xd   : > { %s624_s22 = sshll.u32 %s667_s18, 2  ;;  %v331_v5 = vld [vmem:[%s659_s3] sm:$0xf]  ;;  %s520_s8 = sshll.u32 %s667_s18, 3  ;;  %vm364_vm3 = vcmask 3072   ;;  %vm369_vm4 = vcmask 11272  }
   0xe   : > { %s276_s25 = scalar_lea.vmem %s656_s0, %s624_s22  ;;  %s283_s28 = scalar_lea.vmem %s657_s1, %s624_s22  ;;  %vm375_vm5 = vcmask 19472   ;;  %vm381_vm6 = vcmask 27672  }
   0xf   : > { %v298_v0 = vld [vmem:[%s276_s25] sm:$0xf]  ;;  %s290_s11 = scalar_lea.vmem %s660_s4, %s520_s8  ;;  %s297_s14 = scalar_lea.vmem %s661_s5, %s624_s22 }
  0x10   : > { %v300_v2 = vld [vmem:[%s283_s28] sm:$0xf]  ;;  %v299_v3 = vmax.f32 %v298_v0, 0.0 }
  0x11   : > { %v301_v4 = vmax.f32 %v300_v2, 0.0 }
  0x12   : > { %522 = vmatpush.msk.msra.mxu0 %vm307_vm0, %v299_v3 }
  0x13   : > { %524 = vmatpush.msk.msra.mxu1 %vm307_vm0, %v301_v4  ;;  %523 = vmatmul.msk.f32.vlgmr.msra.gmra.mxu0 %vm303_vm1, %v302_v1 }
  0x14   : > { %525 = vmatmul.msk.f32.vlgmr.msra.gmra.mxu1 %vm303_vm1, %v331_v5 }
  0x90   : > { %v328_v6 = vpop.f32.mrf.mxu0 }
  0x91   : > { %v355_v7 = vpop.f32.mrf.mxu1  ;;  %359 = vst.msk [vmem:[%s290_s11] sm:$0xf] %vm358_vm2, %v328_v6  ;;  %v361_v8 = vsel %vm358_vm2, %v328_v6, 0.0  ;;  %v371_v9 = vmul.f32 %v328_v6, %v328_v6 }
  0x92   : > { %362 = vadd.xlane.f32.xlu0 %v361_v8  ;;  %360 = vst.msk [vmem:[%s290_s11 + $0x4] sm:$0xf] %vm358_vm2, %v355_v7  ;;  %v377_v11 = vmul.f32 %v355_v7, %v355_v7  ;;  %v366_v12 = vsel %vm358_vm2, %v355_v7, 0.0 }
  0x93   : > { %v372_v10 = vsel %vm358_vm2, %v371_v9, 0.0 }
  0x94   : > { %373 = vadd.xlane.f32.xlu1 %v372_v10  ;;  %v378_v13 = vsel %vm358_vm2, %v377_v11, 0.0 }
  0x9a   : > { %367 = vadd.xlane.f32.xlu0 %v366_v12 }
  0x9c   : > { %379 = vadd.xlane.f32.xlu1 %v378_v13 }
 0x105   : > { %v363_v14 = vpop.xlane.xlu0 %362 }
 0x106   : > { %365 = vst.msk [vmem:[%s297_s14] sm:$0xf] %vm364_vm3, %v363_v14 }
 0x107   : > { %v374_v15 = vpop.xlane.xlu1 %373 }
 0x10d   : > { %v368_v16 = vpop.xlane.xlu0 %367 }
 0x10e   : > { %370 = vst.msk [vmem:[%s297_s14] sm:$0xf] %vm369_vm4, %v368_v16 }
 0x10f   : > { %v380_v17 = vpop.xlane.xlu1 %379  ;;  %376 = vst.msk [vmem:[%s297_s14] sm:$0xf] %vm375_vm5, %v374_v15 }
 0x110   : > { %382 = vst.msk [vmem:[%s297_s14] sm:$0xf] %vm381_vm6, %v380_v17 }
 0x111 PF: > { %s16_s20 = sadd.s32 1, %s574_s20   ;;  %s662_s18 = smov %s570_s19 }
 0x112   : > { %p13_p5 = scmp.ge.s32.totalorder %s16_s20, 4   ;;  %s663_s19 = smov %s665_s21 }
 0x114   :  { %15 = sbr.rel (!%p13_p5) target bundleno = 2 (0x2), region = 81 }

// kernel: factorized_reduce.3
= control target key start
LH: loop header
LB: loop body
LE: loop exit
PB: predicated region body
PF: predicated region fallthrough
CT: control target
= control target key end

     0   :  { %s368_s12 = smov 0   ;;  %s370_s13 = smov 0   ;;  %s404_s0 = inlined_call_operand.vmem [shape: f32[2,8,64], index: 0, kind: input, shape index: {}, may-alias: {0,3}]   ;;  %s405_s1 = inlined_call_operand.vmem [shape: f32[8,1], index: 1, kind: input, shape index: {}]   ;;  %s406_s2 = inlined_call_operand.vmem [shape: f32[8,1], index: 2, kind: input, shape index: {}]   ;;  %s407_s3 = inlined_call_operand.vmem [shape: f32[2,8,64], index: 3, kind: output, shape index: {}, may-alias: {0,3}]  }
   0x1   :  { %s372_s14 = smov 0  }
   0x2 LB: > { %s25_s15 = sadd.s32 1, %s341_s13  ;;  %p292_p0 = scmp.ge.s32.totalorder %s345_s14, 1  ;;  %s345_s14 = sphi %s372_s14, %s13_s14   ;;  %s341_s13 = sphi %s370_s13, %s409_s13   ;;  %s337_s12 = sphi %s368_s12, %s408_s12  }
   0x3   : > { %p27_p1 = scmp.ge.s32.totalorder %s25_s15, 2  ;;  %p155_p2 = scmp.lt.s32.totalorder %s345_s14, 3 }
   0x5   : > { %s411_s15 = smov (%p27_p1, %s25_s15), 0  ;;  %p156_p3 = pnand %p292_p0, %p155_p2 }
   0x6   : > { %p183_p4 = scmp.lt.s32.totalorder (!%p156_p3), %s337_s12, 1 }
   0x7   : > { %159 = sbr.rel (%p156_p3) target bundleno = 140 (0x8c), region = 32 }
   0xc   : > { %v198_v0 = vld [vmem:[%s405_s1] sm:$0xff]  ;;  %v347_v1 = vmov 0   ;;  %s413_s12 = smov (!%p183_p4, %s337_s12), 1  ;;  %vm212_vm0 = vcmask 523264  }
   0xd   : > { %322 = vset.pattern.permute.xlu0 %v347_v1  ;;  %v205_v2 = vld [vmem:[%s406_s2] sm:$0xff]  ;;  %s293_s20 = sshll.u32 %s413_s12, 3 }
   0xe   : > { %201 = vperm.xlu0 %322, %v198_v0   ;;  %s189_s23 = scalar_lea.vmem %s404_s0, %s293_s20  ;;  %s196_s26 = scalar_lea.vmem %s407_s3, %s293_s20 }
   0xf   : > { %v197_v4 = vld [vmem:[%s189_s23] sm:$0xff] }
  0x16   : > { %208 = vperm.xlu0 %322, %v205_v2  }
  0x80   : > { %v202_v3 = vpop.permute.xlu0 %201 }
  0x81   : > { %v204_v5 = vmul.f32 %v202_v3, %v197_v4 }
  0x88   : > { %v209_v6 = vpop.permute.xlu0 %208 }
  0x89   : > { %v211_v7 = vadd.f32 %v209_v6, %v204_v5 }
  0x8b   : > { %213 = vst.msk [vmem:[%s196_s26] sm:$0xff] %vm212_vm0, %v211_v7 }
  0x8c PF: > { %s13_s14 = sadd.s32 1, %s345_s14   ;;  %s408_s12 = smov %s341_s13 }
  0x8d   : > { %p10_p5 = scmp.ge.s32.totalorder %s13_s14, 4   ;;  %s409_s13 = smov %s411_s15 }
  0x8f   :  { %12 = sbr.rel (!%p10_p5) target bundleno = 2 (0x2), region = 62 }

</bundles_post_ra>
